<compile_context>
chip_gen: v6e
topology: v6e:2x2x1
jax: 0.10.0
libtpu: 0.0.40
codegen_flags: <defaults>
</compile_context>

<pallas_src>
import jax
import jax.numpy as jnp
from jax.experimental import pallas as pl
from jax.experimental.pallas import tpu as pltpu


def _cfg_denoiser_kernel(sigma_ref, cscale_ref,            # scalar prefetch (SMEM)
                         x_ref,                            # [1, C, THW] (native dtype)
                         upool_ref, cpool_ref,             # [1, 1, Hd] f32 pooled cond
                         w1t_ref, b1_ref, wct_ref,         # [C,C], [C,1], [C,Hd] f32
                         o_ref):                           # [1, C, THW] (native dtype)
    b = pl.program_id(0)
    sigma = sigma_ref[b]
    cs = cscale_ref[0]

    # k-diffusion input scale, folded into the tiny [C, C] weight
    # (C*C-element VPU multiply instead of a full C*THW tile multiply).
    c_in = 1.0 / jnp.sqrt(sigma * sigma + 1.0)
    w_scaled = w1t_ref[...] * c_in                                     # [C, C]

    # CFG blend is linear -> fold it into a per-channel bias using only
    # vector-sized ([1, Hd] / [C, 1]) math.  This is tiny and fully hidden
    # under the x-tile DMA of this memory-bound kernel.
    u_pool = upool_ref[0]                                              # [1, Hd]
    c_pool = cpool_ref[0]                                              # [1, Hd]
    blended = u_pool + (c_pool - u_pool) * cs                          # [1, Hd]
    bias = jnp.sum(wct_ref[...] * blended, axis=1, keepdims=True)      # [C, 1]
    bias = bias + b1_ref[...]                                          # [C, 1]

    # Hot path: lane-dense [C, THW] matmul + one broadcast add.
    x = x_ref[0].astype(jnp.float32)                                   # -> f32 math
    feat = jnp.dot(w_scaled, x, preferred_element_type=jnp.float32)    # [C, THW]
    o_ref[0] = (feat + bias).astype(o_ref.dtype)


def _pick_hw_tile(hw):
    """Largest lane-dense (multiple-of-128) tile that divides HW."""
    for t in (8192, 4096, 2048, 1024, 512, 256, 128):
        if hw % t == 0:
            return t
    return hw   # non-multiple of 128: use the full extent (legal as full dim)


def cfg_denoiser(x_nchw, sigma, uncond, cond, cond_scale, w1, b1, wc):
    """x_nchw: [B, C, H, W]; sigma: [B]; uncond/cond: [B, S, Hd]; cond_scale: scalar."""
    B, C, H, W = x_nchw.shape
    Hd = uncond.shape[2]
    HW = H * W
    thw = _pick_hw_tile(HW)

    # NCHW -> [B, C, HW] is a free reshape (no transpose, no extra HBM pass);
    # stream latents in their native dtype (no wrapper-side cast pass).
    x = x_nchw.reshape(B, C, HW)
    sigma = sigma.astype(jnp.float32)
    cscale = jnp.asarray([cond_scale], dtype=jnp.float32)

    # Pool the conditioning once in the wrapper (independent of x, so it is not
    # recomputed per spatial tile); pre-transpose the tiny params for the
    # channels-first layout.
    u_pool = jnp.mean(uncond.astype(jnp.float32), axis=1, keepdims=True)   # [B, 1, Hd]
    c_pool = jnp.mean(cond.astype(jnp.float32), axis=1, keepdims=True)     # [B, 1, Hd]
    w1t = jnp.transpose(w1).astype(jnp.float32)                            # [C, C]
    b1c = jnp.reshape(b1, (C, 1)).astype(jnp.float32)                      # [C, 1]
    wct = jnp.transpose(wc).astype(jnp.float32)                            # [C, Hd]

    out = pl.pallas_call(
        _cfg_denoiser_kernel,
        out_shape=jax.ShapeDtypeStruct((B, C, HW), x.dtype),
        grid_spec=pltpu.PrefetchScalarGridSpec(
            num_scalar_prefetch=2,                  # sigma, cond_scale -> SMEM
            grid=(B, HW // thw),
            in_specs=[
                pl.BlockSpec((1, C, thw), lambda b, t, sig, cs: (b, 0, t)),   # x
                pl.BlockSpec((1, 1, Hd), lambda b, t, sig, cs: (b, 0, 0)),    # u_pool
                pl.BlockSpec((1, 1, Hd), lambda b, t, sig, cs: (b, 0, 0)),    # c_pool
                pl.BlockSpec((C, C), lambda b, t, sig, cs: (0, 0)),           # w1^T
                pl.BlockSpec((C, 1), lambda b, t, sig, cs: (0, 0)),           # b1 (col)
                pl.BlockSpec((C, Hd), lambda b, t, sig, cs: (0, 0)),          # wc^T
            ],
            out_specs=pl.BlockSpec((1, C, thw), lambda b, t, sig, cs: (b, 0, t)),
        ),
        compiler_params=pltpu.CompilerParams(
            dimension_semantics=("parallel", "parallel")),
    )(sigma, cscale, x, u_pool, c_pool, w1t, b1c, wct)

    # [B, C, HW] -> NCHW is again a free reshape.
    return out.reshape(B, C, H, W)


def _reference(x_nchw, sigma, uncond, cond, cond_scale, w1, b1, wc):
    """Pure-JAX f32 reference replicating the exact concat -> inner -> chunk path."""
    B, C, H, W = x_nchw.shape
    x = x_nchw.reshape(B, C, H * W)                        # [B, C, HW]

    x_in = jnp.concatenate([x, x], axis=0)
    sigma_in = jnp.concatenate([sigma, sigma], axis=0)
    cond_in = jnp.concatenate([uncond, cond], axis=0)

    c_in = 1.0 / jnp.sqrt(sigma_in ** 2 + 1.0)
    feat = jnp.einsum("cd,bcp->bdp", w1, x_in * c_in[:, None, None])
    feat = feat + b1.reshape(1, C, 1)
    bias = jnp.mean(cond_in, axis=1) @ wc                  # [2B, C]
    inner = feat + bias[:, :, None]

    u, c = inner[:B], inner[B:]
    out = u + (c - u) * cond_scale
    return out.reshape(B, C, H, W)


if __name__ == "__main__":
    key = jax.random.PRNGKey(0)
    kx, ks, ku, kc, kw1, kb1, kwc = jax.random.split(key, 7)

    B, C, H, W = 2, 4, 16, 16     # latent-like input
    S, Hd = 8, 32                 # conditioning: seq=8, hidden=32

    x = jax.random.normal(kx, (B, C, H, W), dtype=jnp.float32)
    sigma = jax.random.uniform(ks, (B,), dtype=jnp.float32, minval=0.1, maxval=10.0)
    uncond = jax.random.normal(ku, (B, S, Hd), dtype=jnp.float32)
    cond = jax.random.normal(kc, (B, S, Hd), dtype=jnp.float32)
    cond_scale = 7.5

    # deterministic synthetic inner-model parameters
    # TODO(synk): the real inner_model (a full U-Net denoiser) is a black box in
    # the original module; it is stood in for by this affine channel-mix + pooled
    # conditioning bias so the CFG concat/chunk/blend wrapper itself is exercised.
    w1 = jax.random.normal(kw1, (C, C), dtype=jnp.float32) * 0.5
    b1 = jax.random.normal(kb1, (1, C), dtype=jnp.float32) * 0.1
    wc = jax.random.normal(kwc, (Hd, C), dtype=jnp.float32) * 0.1

    out = cfg_denoiser(x, sigma, uncond, cond, cond_scale, w1, b1, wc)
    out = jax.block_until_ready(out)

    ref = _reference(x, sigma, uncond, cond, cond_scale, w1, b1, wc)
    assert out.shape == (B, C, H, W)
    # f32 streaming end-to-end: only reassociation-level rounding differences.
    assert jnp.allclose(out, ref, atol=1e-4, rtol=1e-4), "mismatch vs reference"

    print("KERNEL_OK")
</pallas_src>

<mosaic_0001>
module attributes {stable_mosaic.version = 11 : i64} {
  func.func @_cfg_denoiser_kernel(%arg0: i32, %arg1: i32, %arg2: memref<2xf32, #tpu.memory_space<smem>>, %arg3: memref<1xf32, #tpu.memory_space<smem>>, %arg4: memref<1x4x256xf32, #tpu.memory_space<vmem>>, %arg5: memref<1x1x32xf32, #tpu.memory_space<vmem>>, %arg6: memref<1x1x32xf32, #tpu.memory_space<vmem>>, %arg7: memref<4x4xf32, #tpu.memory_space<vmem>>, %arg8: memref<4x1xf32, #tpu.memory_space<vmem>>, %arg9: memref<4x32xf32, #tpu.memory_space<vmem>>, %arg10: memref<1x4x256xf32, #tpu.memory_space<vmem>>) attributes {dimension_semantics = [#tpu.dimension_semantics<parallel>, #tpu.dimension_semantics<parallel>], iteration_bounds = array<i64: 2, 1>, scalar_prefetch = 2 : i64, scratch_operands = 0 : i64, tpu.core_type = #tpu.core_type<tc>, window_params = [{transform_indices = @transform_0, window_bounds = array<i64: 1, 4, 256>}, {transform_indices = @transform_1, window_bounds = array<i64: 1, 1, 32>}, {transform_indices = @transform_2, window_bounds = array<i64: 1, 1, 32>}, {pipeline_mode = #tpu.pipeline_mode<synchronous>, transform_indices = @transform_3, window_bounds = array<i64: 4, 4>}, {pipeline_mode = #tpu.pipeline_mode<synchronous>, transform_indices = @transform_4, window_bounds = array<i64: 4, 1>}, {pipeline_mode = #tpu.pipeline_mode<synchronous>, transform_indices = @transform_5, window_bounds = array<i64: 4, 32>}, {transform_indices = @transform_6, window_bounds = array<i64: 1, 4, 256>}]} {
    %0 = arith.index_cast %arg0 : i32 to index
    %1 = memref.load %arg2[%0] : memref<2xf32, #tpu.memory_space<smem>>
    %c0 = arith.constant 0 : index
    %2 = memref.load %arg3[%c0] : memref<1xf32, #tpu.memory_space<smem>>
    %3 = arith.mulf %1, %1 : f32
    %cst = arith.constant 1.000000e+00 : f32
    %4 = arith.addf %3, %cst : f32
    %5 = math.sqrt %4 : f32
    %cst_0 = arith.constant 1.000000e+00 : f32
    %6 = arith.divf %cst_0, %5 : f32
    %c0_1 = arith.constant 0 : index
    %c0_2 = arith.constant 0 : index
    %7 = vector.load %arg7[%c0_1, %c0_2] : memref<4x4xf32, #tpu.memory_space<vmem>>, vector<4x4xf32>
    %8 = vector.broadcast %6 : f32 to vector<4x4xf32>
    %9 = arith.mulf %7, %8 : vector<4x4xf32>
    %c0_3 = arith.constant 0 : index
    %c0_4 = arith.constant 0 : index
    %c0_5 = arith.constant 0 : index
    %10 = vector.load %arg5[%c0_3, %c0_4, %c0_5] : memref<1x1x32xf32, #tpu.memory_space<vmem>>, vector<1x1x32xf32>
    %11 = vector.shape_cast %10 : vector<1x1x32xf32> to vector<1x32xf32>
    %c0_6 = arith.constant 0 : index
    %c0_7 = arith.constant 0 : index
    %c0_8 = arith.constant 0 : index
    %12 = vector.load %arg6[%c0_6, %c0_7, %c0_8] : memref<1x1x32xf32, #tpu.memory_space<vmem>>, vector<1x1x32xf32>
    %13 = vector.shape_cast %12 : vector<1x1x32xf32> to vector<1x32xf32>
    %14 = arith.subf %13, %11 : vector<1x32xf32>
    %15 = vector.broadcast %2 : f32 to vector<1x32xf32>
    %16 = arith.mulf %14, %15 : vector<1x32xf32>
    %17 = arith.addf %11, %16 : vector<1x32xf32>
    %c0_9 = arith.constant 0 : index
    %c0_10 = arith.constant 0 : index
    %18 = vector.load %arg9[%c0_9, %c0_10] : memref<4x32xf32, #tpu.memory_space<vmem>>, vector<4x32xf32>
    %19 = vector.broadcast %17 : vector<1x32xf32> to vector<4x32xf32>
    %20 = arith.mulf %18, %19 : vector<4x32xf32>
    %cst_11 = arith.constant dense<0.000000e+00> : vector<4xf32>
    %21 = vector.multi_reduction <add>, %20, %cst_11 [1] : vector<4x32xf32> to vector<4xf32>
    %22 = vector.shape_cast %21 : vector<4xf32> to vector<4x1xf32>
    %c0_12 = arith.constant 0 : index
    %c0_13 = arith.constant 0 : index
    %23 = vector.load %arg8[%c0_12, %c0_13] : memref<4x1xf32, #tpu.memory_space<vmem>>, vector<4x1xf32>
    %24 = arith.addf %22, %23 : vector<4x1xf32>
    %c0_14 = arith.constant 0 : index
    %c0_15 = arith.constant 0 : index
    %c0_16 = arith.constant 0 : index
    %25 = vector.load %arg4[%c0_14, %c0_15, %c0_16] : memref<1x4x256xf32, #tpu.memory_space<vmem>>, vector<1x4x256xf32>
    %26 = vector.shape_cast %25 : vector<1x4x256xf32> to vector<4x256xf32>
    %cst_17 = arith.constant dense<0.000000e+00> : vector<4x256xf32>
    %27 = tpu.matmul %9, %26, %cst_17 {dimension_numbers = #tpu.dot_dimension_numbers<[1], [0], [0], [1], [0, 0, 1, 1], [], []>} : vector<4x4xf32>, vector<4x256xf32>, vector<4x256xf32> -> vector<4x256xf32>
    %28 = vector.broadcast %24 : vector<4x1xf32> to vector<4x256xf32>
    %29 = arith.addf %27, %28 : vector<4x256xf32>
    %c0_18 = arith.constant 0 : index
    %c0_19 = arith.constant 0 : index
    %c0_20 = arith.constant 0 : index
    %30 = vector.load %arg10[%c0_18, %c0_19, %c0_20] : memref<1x4x256xf32, #tpu.memory_space<vmem>>, vector<1x4x256xf32>
    %31 = vector.shape_cast %30 : vector<1x4x256xf32> to vector<4x256xf32>
    %32 = vector.shape_cast %29 : vector<4x256xf32> to vector<1x4x256xf32>
    tpu.vector_store %arg10[%c0_18, %c0_19, %c0_20], %32 {strides = array<i32>} : memref<1x4x256xf32, #tpu.memory_space<vmem>>, vector<1x4x256xf32>,
    return
  }
  func.func @transform_0(%arg0: i32, %arg1: i32, %arg2: memref<2xf32, #tpu.memory_space<smem>>, %arg3: memref<1xf32, #tpu.memory_space<smem>>) -> (i32, i32, i32) {
    %c0_i32 = arith.constant 0 : i32
    %c0_i32_0 = arith.constant 0 : i32
    return %arg0, %c0_i32, %arg1 : i32, i32, i32
  }
  func.func @transform_1(%arg0: i32, %arg1: i32, %arg2: memref<2xf32, #tpu.memory_space<smem>>, %arg3: memref<1xf32, #tpu.memory_space<smem>>) -> (i32, i32, i32) {
    %c0_i32 = arith.constant 0 : i32
    %c0_i32_0 = arith.constant 0 : i32
    %c0_i32_1 = arith.constant 0 : i32
    return %arg0, %c0_i32, %c0_i32_0 : i32, i32, i32
  }
  func.func @transform_2(%arg0: i32, %arg1: i32, %arg2: memref<2xf32, #tpu.memory_space<smem>>, %arg3: memref<1xf32, #tpu.memory_space<smem>>) -> (i32, i32, i32) {
    %c0_i32 = arith.constant 0 : i32
    %c0_i32_0 = arith.constant 0 : i32
    %c0_i32_1 = arith.constant 0 : i32
    return %arg0, %c0_i32, %c0_i32_0 : i32, i32, i32
  }
  func.func @transform_3(%arg0: i32, %arg1: i32, %arg2: memref<2xf32, #tpu.memory_space<smem>>, %arg3: memref<1xf32, #tpu.memory_space<smem>>) -> (i32, i32) {
    %c0_i32 = arith.constant 0 : i32
    %c0_i32_0 = arith.constant 0 : i32
    %c0_i32_1 = arith.constant 0 : i32
    return %c0_i32, %c0_i32_0 : i32, i32
  }
  func.func @transform_4(%arg0: i32, %arg1: i32, %arg2: memref<2xf32, #tpu.memory_space<smem>>, %arg3: memref<1xf32, #tpu.memory_space<smem>>) -> (i32, i32) {
    %c0_i32 = arith.constant 0 : i32
    %c0_i32_0 = arith.constant 0 : i32
    %c0_i32_1 = arith.constant 0 : i32
    return %c0_i32, %c0_i32_0 : i32, i32
  }
  func.func @transform_5(%arg0: i32, %arg1: i32, %arg2: memref<2xf32, #tpu.memory_space<smem>>, %arg3: memref<1xf32, #tpu.memory_space<smem>>) -> (i32, i32) {
    %c0_i32 = arith.constant 0 : i32
    %c0_i32_0 = arith.constant 0 : i32
    %c0_i32_1 = arith.constant 0 : i32
    return %c0_i32, %c0_i32_0 : i32, i32
  }
  func.func @transform_6(%arg0: i32, %arg1: i32, %arg2: memref<2xf32, #tpu.memory_space<smem>>, %arg3: memref<1xf32, #tpu.memory_space<smem>>) -> (i32, i32, i32) {
    %c0_i32 = arith.constant 0 : i32
    %c0_i32_0 = arith.constant 0 : i32
    return %arg0, %c0_i32, %arg1 : i32, i32, i32
  }
}

</mosaic_0001>

<bundles_post_ra>
// kernel: tpu_custom_call.1
= control target key start
LH: loop header
LB: loop body
LE: loop exit
PB: predicated region body
PF: predicated region fallthrough
CT: control target
= control target key end

     0   :  { %s789_s27 = smov [#allocation3]   ;;  %s1001_s0 = inlined_call_operand.hbm [shape: f32[2], index: 0, kind: input, shape index: {}]   ;;  %s1002_s1 = inlined_call_operand.<no memory space> [shape: f32[1], index: 1, kind: input, shape index: {}]   ;;  %s1003_s2 = inlined_call_operand.hbm [shape: f32[2,4,256], index: 2, kind: input, shape index: {}]   ;;  %s1004_s3 = inlined_call_operand.vmem [shape: f32[2,1,32], index: 3, kind: input, shape index: {}]   ;;  %s1005_s4 = inlined_call_operand.vmem [shape: f32[2,1,32], index: 4, kind: input, shape index: {}]   ;;  %s1006_s5 = inlined_call_operand.vmem [shape: f32[4,4], index: 5, kind: input, shape index: {}]   ;;  %s1007_s6 = inlined_call_operand.vmem [shape: f32[4,1], index: 6, kind: input, shape index: {}]   ;;  %s1008_s7 = inlined_call_operand.vmem [shape: f32[4,32], index: 7, kind: input, shape index: {}]   ;;  %s1009_s8 = inlined_call_operand.hbm [shape: f32[2,4,256], index: 8, kind: output, shape index: {}]  }
   0x1   :  { %1011 = sst [smem:[#allocation12_spill]] %s1003_s2 }
   0x2   :  { %14 = dma.hbm_to_smem %s1001_s0, 16, %s789_s27, [#allocation2] }
   0x3   :  { %15 = sst [smem:[#allocation4]] %s1002_s1 }
   0x4   :  { %755 = dma.done.wait [#allocation2], 16 }
   0x5   :  { %756 = vsyncadd [#allocation2], 4294967280 }
   0x6   :  { %17 = sfence }
   0x7   :  { %18 = vsyncpa [#allocation6], 0 }
   0x8   :  { %20 = vsyncpa [#allocation6 + $0x1], 0 }
   0x9   :  { %21 = vsyncpa [#allocation7], 0 }
   0xa   :  { %23 = vsyncpa [#allocation7 + $0x1], 0  ;;  %s845_s10 = smov 0   ;;  %s847_s11 = smov 0  }
   0xb   :  { %s849_s12 = smov 0   ;;  %s851_s13 = smov 0  }
   0xc   :  { %s853_s0 = smov 0   ;;  %s855_s14 = smov 0  }
   0xd LB: > { %s574_s1 = sadd.s32 4294967295, %s787_s14   ;;  %s575_s15 = sadd.s32 4294967294, %s787_s14   ;;  %s787_s14 = sphi %s855_s14, %s29_s14   ;;  %s783_s0 = sphi %s853_s0, %s1025_s0   ;;  %s779_s13 = sphi %s851_s13, %s1024_s13   ;;  %s775_s12 = sphi %s849_s12, %s1023_s12   ;;  %s771_s11 = sphi %s847_s11, %s1022_s11   ;;  %s767_s10 = sphi %s845_s10, %s1021_s10  }
   0xe   : > { %s41_s16 = sadd.s32 1, %s783_s0  ;;  %s50_s17 = sadd.s32 1, %s775_s12 }
   0xf   : > { %p43_p0 = scmp.ge.s32.totalorder %s41_s16, 2  ;;  %p57_p1 = scmp.ne.s32.totalorder %s775_s12, %s771_s11 }
  0x10   : > { %p58_p2 = scmp.eq.s32.totalorder %s787_s14, 0  ;;  %p63_p3 = scmp.ne.s32.totalorder %s771_s11, %s767_s10 }
  0x11   : > { %s1027_s16 = smov (%p43_p0, %s41_s16), 0  ;;  %p64_p5 = scmp.eq.s32.totalorder %s574_s1, 0 }
  0x12   : > { %p886_p4 = por %p58_p2, %p57_p1  ;;  %s45_s19 = ssub.s32 %s783_s0, %s1027_s16 }
  0x13   : > { %p204_p6 = scmp.eq.s32.totalorder %s574_s1, 1  ;;  %p48_p7 = scmp.eq.s32.totalorder %s45_s19, 0 }
  0x14   : > { %p892_p8 = por %p64_p5, %p63_p3  ;;  %p210_p10 = scmp.eq.s32.totalorder %s575_s15, 1 }
  0x15   : > { %p896_p9 = por %p204_p6, %p57_p1  ;;  %p610_p13 = scmp.lt.s32.totalorder %s787_s14, 2 }
  0x16   : > { %s901_s22 = scalar_select %p48_p7, %s775_s12, %s50_s17  }
  0x17   : > { %p903_p11 = por %p210_p10, %p63_p3  ;;  %s239_s24 = sand.u32 1, %s775_s12  }
  0x18   : > { %s578_s25 = sshll.u32 %s239_s24, 3  ;;  %s592_s26 = sshll.u32 %s783_s0, 7 }
  0x19   : > { %s1015_s23 = scalar_select %p903_p11, 1, 0 }
  0x1a   : > { %s1016_s2 = sld [smem:[#allocation12_spill]]  ;;  %s243_s30 = scalar_lea.vmem [#allocation5], %s578_s25 }
  0x1b   : > { %s253_s9 = sshll.u32 %s243_s30, 4  ;;  %p916_p0 = pnand %p610_p13, %p886_p4  ;;  %s254_s9 = int_to_ptr.vmem [resolvable:$true] %s253_s9 }
  0x1c   : > { %p581_p1 = scmp.ge.s32.totalorder %s787_s14, 1  ;;  %p270_p2 = scmp.lt.s32.totalorder %s787_s14, 3 }
  0x1d   : > { %s240_s15 = scalar_lea.sflag [#allocation6], %s239_s24  ;;  %p679_p3 = pneg %p916_p0 }
  0x1e   : > { %s690_s17 = scalar_lea.vmem %s254_s9, 128  ;;  %s790_s19 = smov [#allocation5]  }
  0x1f   : > { %p691_p5 = scmp.ne.s32.totalorder %s254_s9, %s690_s17 }
  0x20   : > { %s251_s29 = scalar_lea.hbm %s1016_s2, %s592_s26  ;;  %s695_s26 = sshll.u32 %s790_s19, 4  ;;  %s696_s26 = int_to_ptr.vmem [resolvable:$false] %s695_s26 }
  0x21   : > { %p693_p6 = pnand %p691_p5, %p679_p3  ;;  %s697_s25 = scalar_lea.vmem %s696_s26, 256 }
  0x22   : > { %p698_p10 = scmp.lt.s32.totalorder %s254_s9, %s696_s26  ;;  %p699_p12 = scmp.lt.s32.totalorder %s697_s25, %s690_s17 }
  0x23   : > { %p694_p7 = pneg %p693_p6 }
  0x24   : > { %p700_p4 = por %p699_p12, %p698_p10 }
  0x26   : > { %p701_p13 = pnand %p700_p4, %p694_p7 }
  0x28   : > { %704 = shalt.err (!%p701_p13)
}
  0x29   : > { %605 = dma.hbm_to_vmem [thread:$0]  (!%p916_p0), %s251_s29, 128, %s254_s9, %s240_s15  }
  0x2a   : > { %p271_p11 = pnand %p581_p1, %p270_p2 }
  0x2b   : > { %s931_s18 = sand.u32 (!%p271_p11), 1, %s771_s11  }
  0x2c   : > { %274 = sbr.rel (%p271_p11) target bundleno = 409 (0x199), region = 44  ;;  %s1010_s24 = sshll.u32 (!%p271_p11), %s931_s18, 3 }
  0x2d   : > { %s277_s27 = scalar_lea.sflag (!%p271_p11), [#allocation6], %s931_s18  ;;  %s280_s28 = scalar_lea.vmem (!%p271_p11), [#allocation5], %s1010_s24 }
  0x31   : > { %758 = dma.done.wait (%p892_p8), %s277_s27, 128  }
  0x32   : > { %760 = vsyncadd (%p892_p8), %s277_s27, 4294967168  ;;  %p316_p11 = scmp.lt.s32.totalorder %s779_s13, 1  ;;  %s323_s29 = sld [smem:[#allocation3 + %s779_s13]]  ;;  %v350_v0 = vlaneseq  ;;  %v348_v10 = vld [vmem:[%s1008_s7] sm:$0xf]  ;;  %vm356_vm0 = vcmask 257024  }
  0x33   : > { %s324_s9 = sld [smem:[#allocation4]]  ;;  %v362_v12 = vld [vmem:[%s280_s28] sm:$0xff]  ;;  %vm374_vm1 = vcmask 1043456   ;;  %v791_v16 = vmov 0.0   ;;  %v792_v22 = vmov 0   ;;  %vm370_vm4 = vcmask 31744  }
  0x34   : > { %s317_s30 = scalar_select %p316_p11, %s779_s13, 1  ;;  %v351_v3 = vshrl.u32 %v350_v0, 7  ;;  %v369_v13 = vcombine.high %v362_v12, %v362_v12  ;;  %443 = vmatprep.mubr.f32.mxu0 %v791_v16  ;;  %663 = vset.pattern.permute.xlu0 %v792_v22  ;;  %v339_v25 = vld [vmem:[%s1006_s5] sm:$0xf] }
  0x35   : > { %v360_v28 = vld [vmem:[%s1007_s6] sm:$0xf]  ;;  %s593_s1 = sshll.u32 %s779_s13, 7  ;;  %s1018_s15 = sshll.u32 %s931_s18, 3 }
  0x36   : > { %s318_s17 = scalar_lea.vmem %s1004_s3, %s317_s30  ;;  %s321_s25 = scalar_lea.vmem %s1005_s4, %s317_s30  ;;  %v352_v8 = vsub.s32 0, %v351_v3  ;;  %584 = vmatprep.subr.msk.mxu0 %vm374_vm1, %v369_v13 }
  0x37   : > { %v342_v1 = vld [vmem:[%s318_s17] sm:$0x1]  ;;  %585 = vmatpush1.msk.msra.mxu0 %vm374_vm1, %v362_v12  ;;  %s314_s17 = scalar_lea.vmem [#allocation8], %s1018_s15  ;;  %s456_s27 = scalar_lea.sflag [#allocation7], %s931_s18 }
  0x38   : > { %s325_s24 = smul.f32 %s323_s29, %s323_s29  ;;  %v343_v2 = vld [vmem:[%s321_s25] sm:$0x1]  ;;  %s472_s19 = sshll.u32 %s314_s17, 4  ;;  %s473_s19 = int_to_ptr.vmem [resolvable:$true] %s472_s19 }
  0x39   : > { %v344_v4 = vsub.f32 %v343_v2, %v342_v1  ;;  %v345_v5 = vstv %s324_s9 }
  0x3a   : > { %s326_s20 = sadd.f32 1.0, %s325_s24  ;;  %s793_s24 = smov [#allocation8]  }
  0x3b   : > { %v346_v6 = vmul.f32 %v345_v5, %v344_v4  ;;  %s709_s13 = sshll.u32 %s793_s24, 4  ;;  %s710_s13 = int_to_ptr.vmem [resolvable:$false] %s709_s13 }
  0x3c   : > { %v327_v7 = vstv %s326_s20  ;;  %s470_s20 = scalar_lea.hbm %s1009_s8, %s593_s1  ;;  %s711_s28 = scalar_lea.vmem %s710_s13, 256 }
  0x3d   : > { %665 = vrsqrt.f32 %v327_v7  ;;  %v347_v9 = vadd.f32 %v346_v6, %v342_v1  ;;  %vm330_vm2 = vcmp.eq.f32.partialorder %v327_v7, inf  ;;  %v333_v18 = vand.u32 2147483648, %v327_v7  ;;  %p712_p1 = scmp.lt.s32.totalorder %s473_s19, %s710_s13 }
  0x3e   : > { %vm332_vm3 = vcmp.eq.f32.partialorder %v327_v7, 0.0 }
  0x3f   : > { %v353_v11 = vrot.slane %v347_v9, %v352_v8 }
  0x41   : > { %v355_v14 = vmul.f32 %v353_v11, %v348_v10 }
  0x43   : > { %v357_v15 = vsel %vm356_vm0, %v355_v14, 0.0 }
  0x44   : > { %358 = vadd.xlane.f32.xlu0 %v357_v15 }
  0x4a   : > { %v666_v17 = vpop.eup %665 }
  0x4b   : > { %v329_v19 = vmul.f32 %v666_v17, %v327_v7 }
  0x4d   : > { %v331_v20 = vsel %vm330_vm2, %v327_v7, %v329_v19 }
  0x4e   : > { %v334_v21 = vsel %vm332_vm3, %v333_v18, %v331_v20 }
  0x4f   : > { %594 = vpush %v334_v21 }
  0x80   : > { %s595_s2 = spop %594 }
  0x81   : > { %v336_v23 = vstv %s595_s2  ;;  %s705_s2 = scalar_lea.vmem %s473_s19, 128 }
  0x82   : > { %667 = vrcp.f32 %v336_v23  ;;  %p706_p8 = scmp.ne.s32.totalorder %s473_s19, %s705_s2  ;;  %p713_p2 = scmp.lt.s32.totalorder %s711_s28, %s705_s2 }
  0x84   : > { %p707_p12 = pnand %p706_p8, %p896_p9  ;;  %p714_p3 = por %p713_p2, %p712_p1 }
  0x86   : > { %p708_p0 = pneg %p707_p12 }
  0x88   : > { %p715_p5 = pnand %p714_p3, %p708_p0 }
  0x8f   : > { %v668_v24 = vpop.eup %667 }
  0x90   : > { %596 = vpush %v668_v24 }
  0xc1   : > { %s597_s29 = spop %596 }
  0xc2   : > { %v340_v26 = vstv %s597_s29 }
  0xc3   : > { %v341_v27 = vmul.f32 %v340_v26, %v339_v25 }
  0xc5   : > { %586 = vmatmul.mubr.msk.f32.vlgmr.msra.gmra.mxu0 %vm370_vm4, %v341_v27 }
  0xcd   : > { %v359_v29 = vpop.xlane.xlu0 %358 }
  0xce   : > { %v361_v30 = vadd.f32 %v360_v28, %v359_v29 }
  0xd0   : > { %365 = vperm.xlu0 %663, %v361_v30  }
 0x14b   : > { %v366_v31 = vpop.permute.xlu0 %365 }
 0x185   : > { %v445_v32 = vpop.f32.mrf.mxu0 }
 0x186   : > { %v446_v34 = vadd.f32 %v445_v32, %v366_v31 }
 0x187   : > { %v447_v33 = vpop.f32.mrf.mxu0 }
 0x188   : > { %v448_v35 = vadd.f32 %v447_v33, %v366_v31 }
 0x18a   : > { %v452_v36 = vcombine.low %v446_v34, %v448_v35 }
 0x18c   : > { %454 = vst [vmem:[%s314_s17] sm:$0xff] %v452_v36 }
 0x18d   : > { %718 = shalt.err (!%p715_p5)
}
 0x18e   : > { %s719_s29 = scalar_lea.hbm %s470_s20, 128  ;;  %s723_s9 = scalar_lea.hbm %s1009_s8, 256 }
 0x18f   : > { %p720_p6 = scmp.ne.s32.totalorder %s470_s20, %s719_s29  ;;  %p724_p4 = scmp.lt.s32.totalorder %s470_s20, %s1009_s8 }
 0x190   : > { %p725_p13 = scmp.lt.s32.totalorder %s723_s9, %s719_s29 }
 0x191   : > { %p721_p7 = pnand %p720_p6, %p896_p9 }
 0x192   : > { %p726_p11 = por %p725_p13, %p724_p4 }
 0x193   : > { %p722_p10 = pneg %p721_p7 }
 0x195   : > { %p727_p8 = pnand %p726_p11, %p722_p10 }
 0x197   : > { %730 = shalt.err (!%p727_p8)
}
 0x198   : > { %600 = dma.vmem_to_hbm [thread:$0]  (%p896_p9), %s473_s19, 128, %s470_s20, %s456_s27  }
 0x199 PF: > { %s484_s17 = sand.u32 1, %s767_s10   ;;  %p1019_p12 = scmp.ne.s32.totalorder %s1015_s23, 0 }
 0x19a   : > { %p1020_p0 = scmp.ge.s32.totalorder %s787_s14, 2  ;;  %s485_s26 = scalar_lea.sflag [#allocation7], %s484_s17 }
 0x19c   : > { %p607_p1 = pnand %p1020_p0, %p1019_p12 }
 0x19e   : > { %p608_p2 = pneg %p607_p1 }
 0x1a0   : > { %762 = dma.done.wait (%p608_p2), %s485_s26, 128  }
 0x1a1   : > { %764 = vsyncadd (%p608_p2), %s485_s26, 4294967168  ;;  %s29_s14 = sadd.s32 1, %s787_s14   ;;  %s1021_s10 = smov %s771_s11 }
 0x1a2   : > { %p26_p3 = scmp.ge.s32.totalorder %s29_s14, 4   ;;  %s1022_s11 = smov %s775_s12 }
 0x1a3   : > { %s1023_s12 = smov %s901_s22  ;;  %s1024_s13 = smov %s783_s0 }
 0x1a4   : > { %s1025_s0 = smov %s1027_s16  ;;  %28 = sbr.rel (!%p26_p3) target bundleno = 13 (0xd), region = 95 }
 0x1a9   :  { %490 = vsyncpa [#allocation6], 1 }
 0x1aa   :  { %492 = vsyncpa [#allocation6 + $0x1], 1 }
 0x1ab   :  { %493 = vsyncpa [#allocation7], 1 }
 0x1ac   :  { %495 = vsyncpa [#allocation7 + $0x1], 1 }

</bundles_post_ra>
